<compile_context>
chip_gen: v7x
topology: tpu7x:2x2x1
jax: 0.10.0
libtpu: 0.0.40
codegen_flags: <defaults>
</compile_context>

<pallas_src>
import math

import numpy as np

import jax
import jax.numpy as jnp
from jax import lax
from jax.experimental import pallas as pl
from jax.experimental.pallas import tpu as pltpu


def _cdiv(a, b):
    return -(-a // b)


def _round_up(a, b):
    return _cdiv(a, b) * b


def _build_weights(w1):
    """Constant MXU weights WP, WQ of shape (2*w, 4*w1), w = 2*w1."""
    w = 2 * w1
    U1 = np.array([[-0.5, -0.5, -0.5, 0.5],
                   [0.5, -0.5, 0.5, 0.5],
                   [0.5, 0.5, -0.5, 0.5],
                   [0.5, -0.5, -0.5, -0.5]], dtype=np.float64)
    U2 = np.array([[-1., 1., 1., -1.],
                   [-1., -1., -1., -1.],
                   [-1., -1., 1., 1.],
                   [1., -1., 1., -1.]], dtype=np.float64)

    WP = np.zeros((2 * w, 4 * w1), dtype=np.float64)
    WQ = np.zeros((2 * w, 4 * w1), dtype=np.float64)

    def lane(comp, col):
        # comp: 0=(even row, even col), 1=(even row, odd col),
        #       2=(odd row, even col),  3=(odd row, odd col)
        return (comp // 2) * w + 2 * col + (comp % 2)

    for j in range(w1):
        jr = (j + 1) % w1                    # source column after the W-roll
        for s in range(4):                   # output slab: A, B, C, D
            o = s * w1 + j
            for comp in range(4):            # 2x2 patch components c0..c3
                # terms NOT H-rolled: y0 = x1_0 (col j), t3 = roll_w(x1_2) (col jr)
                WP[lane(comp, j), o] += U2[s, 0] * U1[0, comp]
                WP[lane(comp, jr), o] += U2[s, 2] * U1[2, comp]
                # terms H-rolled afterwards: x1_1 (col j), roll_w(x1_3) (col jr)
                WQ[lane(comp, j), o] += U2[s, 1] * U1[1, comp]
                WQ[lane(comp, jr), o] += U2[s, 3] * U1[3, comp]
    return WP.astype(np.float32), WQ.astype(np.float32)


def _make_nlwt_kernel(h1, rows, w1, fused):
    """rows = planes_per_block * h1; input block is (rows, 2*w) = (rows, 4*w1)."""

    def kernel(x_ref, wp_ref, wq_ref, *out_refs):
        xv = x_ref[...].astype(jnp.float32)                        # (rows, 2w)
        p = jnp.dot(xv, wp_ref[...], preferred_element_type=jnp.float32)
        q = jnp.dot(xv, wq_ref[...], preferred_element_type=jnp.float32)

        # Per-plane roll of q by -1 along the row (sublane) axis:
        #   qr[p*h1 + i] = q[p*h1 + (i + 1) % h1]
        if h1 == 1:
            qr = q
        else:
            down = jnp.concatenate([q[1:, :], q[:1, :]], axis=0)   # global -1
            s = h1 - 1
            up = jnp.concatenate([q[rows - s:, :], q[:rows - s, :]], axis=0)
            row = lax.broadcasted_iota(jnp.int32, (rows, 1), 0)
            is_last = (row % h1) == (h1 - 1)       # last row of each plane
            qr = jnp.where(is_last, up, down)

        res = p + qr                               # packed [A | B | C | D]
        if fused:
            out_refs[0][...] = res.astype(out_refs[0].dtype)
        else:
            for k in range(4):
                out_refs[k][...] = res[:, k * w1:(k + 1) * w1].astype(out_refs[k].dtype)

    return kernel


def _chip_policy():
    """Returns (block_budget_bytes, vmem_limit_bytes_or_None, want_even_grid)."""
    try:
        kind = jax.devices()[0].device_kind.lower()
    except Exception:
        kind = ""
    if "v7" in kind:
        # 2 TensorCores sharing 64 MiB VMEM: modest blocks, even grid length.
        return 16 << 20, 48 << 20, True
    if "v5p" in kind or "v4" in kind:
        # Megacore (2 TCs), 128 MiB VMEM.
        return 32 << 20, 96 << 20, True
    if "v5" in kind or "v6" in kind:
        # Single TensorCore, 128 MiB VMEM: largest block wins (grid is a loop).
        return 32 << 20, 96 << 20, False
    return 8 << 20, None, False


def _pick_tiling(bc, h1, per_plane_bytes, fixed_bytes, budget, want_even_grid):
    """Pick T = planes per grid step.  Returns (T, grid, padded_bc)."""
    m = 8 // math.gcd(h1, 8)                 # T multiple of m => (T*h1) % 8 == 0
    avail = max(per_plane_bytes * m, budget - fixed_bytes)
    cap = max(m, (avail // per_plane_bytes) // m * m)
    T = min(cap, _round_up(bc, m))

    if want_even_grid:
        g = _cdiv(bc, T)
        if g == 1 and _round_up(bc, m) >= 2 * m:
            T = _round_up(_cdiv(bc, 2), m)   # split the work over 2 steps
        elif g > 1 and g % 2 == 1:
            T2 = _round_up(_cdiv(bc, g + 1), m)
            if _cdiv(bc, T2) % 2 == 0:
                T = T2

    # Prefer an exact divisor of bc close to T (avoids the padding copy of x).
    best = 0
    for cand in range(T, 0, -m):
        if bc % cand == 0:
            best = cand
            break
    if best and best * 2 >= T:
        if (not want_even_grid) or _cdiv(bc, best) % 2 == 0 \
                or _cdiv(bc, best) % 2 == _cdiv(bc, T) % 2:
            T = best

    grid = _cdiv(bc, T)
    return T, grid, grid * T


def nlwt_forward(x):
    orisize = tuple(x.shape)
    b, c, h0, w0 = x.shape
    h1, w1 = h0 // 2, w0 // 2
    h, w = 2 * h1, 2 * w1
    # torch's im2col(filter=2, stride=2) silently drops a trailing odd row/col.
    if (h, w) != (h0, w0):
        x = x[:, :, :h, :w]

    bc = b * c
    itemsize = jnp.dtype(x.dtype).itemsize

    budget, vmem_limit, want_even = _chip_policy()

    # Per-plane VMEM: double-buffered input + output blocks plus ~4 live f32
    # intermediates in the kernel body.  Weights are a fixed cost.
    plane_io = h1 * 4 * w1 * itemsize
    plane_f32 = h1 * 4 * w1 * 4
    per_plane = 4 * plane_io + 4 * plane_f32
    fixed = 2 * 2 * (2 * w) * (4 * w1) * 4
    T, grid_n, bc_pad = _pick_tiling(bc, h1, per_plane, fixed, budget, want_even)
    rows = T * h1

    # Pure reshape (no copy): row q = p*h1 + i holds [x[p, 2i, :], x[p, 2i+1, :]].
    xr = x.reshape(bc * h1, 2 * w)
    if bc_pad != bc:
        pad = jnp.zeros(((bc_pad - bc) * h1, 2 * w), xr.dtype)
        xr = jnp.concatenate([xr, pad], axis=0)

    wp_np, wq_np = _build_weights(w1)
    wp = jnp.asarray(wp_np)
    wq = jnp.asarray(wq_np)

    fused = w1 < 128                 # lane-dense packed output when slabs are narrow
    kernel = _make_nlwt_kernel(h1, rows, w1, fused)

    total_rows = bc_pad * h1
    if fused:
        out_shape = jax.ShapeDtypeStruct((total_rows, 4 * w1), x.dtype)
        out_specs = pl.BlockSpec((rows, 4 * w1), lambda i: (i, 0))
    else:
        one = jax.ShapeDtypeStruct((total_rows, w1), x.dtype)
        out_shape = (one, one, one, one)
        spec1 = pl.BlockSpec((rows, w1), lambda i: (i, 0))
        out_specs = (spec1, spec1, spec1, spec1)

    flops = 2 * total_rows * (2 * w) * (8 * w1) + 8 * total_rows * 4 * w1
    bytes_accessed = (total_rows * 2 * w * itemsize          # read x
                      + total_rows * 4 * w1 * itemsize       # write A..D
                      + 2 * (2 * w) * (4 * w1) * 4)          # weights
    cost = pl.CostEstimate(flops=int(flops), transcendentals=0,
                           bytes_accessed=int(bytes_accessed))

    cp = dict(dimension_semantics=("parallel",))
    if vmem_limit is not None:
        cp["vmem_limit_bytes"] = int(vmem_limit)

    result = pl.pallas_call(
        kernel,
        out_shape=out_shape,
        grid_spec=pltpu.PrefetchScalarGridSpec(
            num_scalar_prefetch=0,
            grid=(grid_n,),
            in_specs=[
                pl.BlockSpec((rows, 2 * w), lambda i: (i, 0)),     # x strips
                pl.BlockSpec((2 * w, 4 * w1), lambda i: (0, 0)),   # WP (constant)
                pl.BlockSpec((2 * w, 4 * w1), lambda i: (0, 0)),   # WQ (constant)
            ],
            out_specs=out_specs,
        ),
        compiler_params=pltpu.CompilerParams(**cp),
        cost_estimate=cost,
    )(xr, wp, wq)

    nrows = bc * h1
    if fused:
        A = result[:nrows, 0 * w1:1 * w1].reshape(b, c, h1, w1)
        B = result[:nrows, 1 * w1:2 * w1].reshape(b, c, h1, w1)
        C = result[:nrows, 2 * w1:3 * w1].reshape(b, c, h1, w1)
        D = result[:nrows, 3 * w1:4 * w1].reshape(b, c, h1, w1)
    else:
        A2, B2, C2, D2 = result
        A = A2[:nrows].reshape(b, c, h1, w1)
        B = B2[:nrows].reshape(b, c, h1, w1)
        C = C2[:nrows].reshape(b, c, h1, w1)
        D = D2[:nrows].reshape(b, c, h1, w1)
    return A, B, C, D, orisize


def _nlwt_reference(x):
    # Pure-JAX reference mirroring the PyTorch code path (even spatial dims).
    b, c, h, w = x.shape
    h1, w1 = h // 2, w // 2
    U1 = jnp.array([[-0.5, -0.5, -0.5, 0.5],
                    [0.5, -0.5, 0.5, 0.5],
                    [0.5, 0.5, -0.5, 0.5],
                    [0.5, -0.5, -0.5, -0.5]], dtype=x.dtype)
    U2 = jnp.array([[-1, 1, 1, -1],
                    [-1, -1, -1, -1],
                    [-1, -1, 1, 1],
                    [1, -1, 1, -1]], dtype=x.dtype)
    xr = x.reshape(b, c, h1, 2, w1, 2)
    col = jnp.stack(
        [xr[:, :, :, 0, :, 0], xr[:, :, :, 0, :, 1],
         xr[:, :, :, 1, :, 0], xr[:, :, :, 1, :, 1]], axis=2
    ).reshape(b, c, 4, h1 * w1)
    x1 = jnp.einsum("ij,bcjl->bcil", U1, col)
    T22 = jnp.roll(x1[:, :, 1].reshape(b, c, h1, w1), -1, axis=2)
    T32 = jnp.roll(x1[:, :, 2].reshape(b, c, h1, w1), -1, axis=3)
    T42 = jnp.roll(x1[:, :, 3].reshape(b, c, h1, w1), (-1, -1), axis=(2, 3))
    x1 = x1.at[:, :, 1].set(T22.reshape(b, c, -1))
    x1 = x1.at[:, :, 2].set(T32.reshape(b, c, -1))
    x1 = x1.at[:, :, 3].set(T42.reshape(b, c, -1))
    x2 = jnp.einsum("ij,bcjl->bcil", U2, x1)
    return tuple(x2[:, :, k].reshape(b, c, h1, w1) for k in range(4))


if __name__ == "__main__":
    key = jax.random.PRNGKey(0)
    x = jax.random.normal(key, (2, 4, 16, 16), dtype=jnp.float32)

    A, B, C, D, orisize = nlwt_forward(x)
    jax.block_until_ready((A, B, C, D))

    refA, refB, refC, refD = _nlwt_reference(x)
    np.testing.assert_allclose(np.asarray(A), np.asarray(refA), rtol=1e-5, atol=1e-5)
    np.testing.assert_allclose(np.asarray(B), np.asarray(refB), rtol=1e-5, atol=1e-5)
    np.testing.assert_allclose(np.asarray(C), np.asarray(refC), rtol=1e-5, atol=1e-5)
    np.testing.assert_allclose(np.asarray(D), np.asarray(refD), rtol=1e-5, atol=1e-5)
    assert orisize == (2, 4, 16, 16)

    # More shapes: bc not divisible by the chosen T (zero-padded planes) and
    # h1 % 8 != 0 (legal-block-shape handling via the multiple-of-m rule).
    for i, shape in enumerate([(2, 3, 8, 32), (1, 5, 6, 10)]):
        xi = jax.random.normal(jax.random.PRNGKey(i + 1), shape, dtype=jnp.float32)
        outs = nlwt_forward(xi)
        jax.block_until_ready(outs[:4])
        refs = _nlwt_reference(xi)
        for o, r in zip(outs[:4], refs):
            np.testing.assert_allclose(np.asarray(o), np.asarray(r), rtol=1e-5, atol=1e-5)
        assert outs[4] == shape

    print("KERNEL_OK")
</pallas_src>

<mosaic_0001>
module attributes {stable_mosaic.version = 11 : i64} {
  func.func @kernel(%arg0: i32, %arg1: memref<64x32xf32, #tpu.memory_space<vmem>>, %arg2: memref<32x32xf32, #tpu.memory_space<vmem>>, %arg3: memref<32x32xf32, #tpu.memory_space<vmem>>, %arg4: memref<64x32xf32, #tpu.memory_space<vmem>>) attributes {dimension_semantics = [#tpu.dimension_semantics<parallel>], iteration_bounds = array<i64: 1>, scalar_prefetch = 0 : i64, scratch_operands = 0 : i64, tpu.core_type = #tpu.core_type<tc>, window_params = [{transform_indices = @transform_0, window_bounds = array<i64: 64, 32>}, {pipeline_mode = #tpu.pipeline_mode<synchronous>, transform_indices = @transform_1, window_bounds = array<i64: 32, 32>}, {pipeline_mode = #tpu.pipeline_mode<synchronous>, transform_indices = @transform_2, window_bounds = array<i64: 32, 32>}, {transform_indices = @transform_3, window_bounds = array<i64: 64, 32>}]} {
    %c0 = arith.constant 0 : index
    %c0_0 = arith.constant 0 : index
    %0 = vector.load %arg1[%c0, %c0_0] : memref<64x32xf32, #tpu.memory_space<vmem>>, vector<64x32xf32>
    %c0_1 = arith.constant 0 : index
    %c0_2 = arith.constant 0 : index
    %1 = vector.load %arg2[%c0_1, %c0_2] : memref<32x32xf32, #tpu.memory_space<vmem>>, vector<32x32xf32>
    %cst = arith.constant dense<0.000000e+00> : vector<64x32xf32>
    %2 = tpu.matmul %0, %1, %cst {dimension_numbers = #tpu.dot_dimension_numbers<[1], [0], [0], [1], [0, 0, 1, 1], [], []>} : vector<64x32xf32>, vector<32x32xf32>, vector<64x32xf32> -> vector<64x32xf32>
    %c0_3 = arith.constant 0 : index
    %c0_4 = arith.constant 0 : index
    %3 = vector.load %arg3[%c0_3, %c0_4] : memref<32x32xf32, #tpu.memory_space<vmem>>, vector<32x32xf32>
    %cst_5 = arith.constant dense<0.000000e+00> : vector<64x32xf32>
    %4 = tpu.matmul %0, %3, %cst_5 {dimension_numbers = #tpu.dot_dimension_numbers<[1], [0], [0], [1], [0, 0, 1, 1], [], []>} : vector<64x32xf32>, vector<32x32xf32>, vector<64x32xf32> -> vector<64x32xf32>
    %5 = vector.extract_strided_slice %4 {offsets = [1, 0], sizes = [63, 32], strides = [1, 1]} : vector<64x32xf32> to vector<63x32xf32>
    %6 = vector.extract_strided_slice %4 {offsets = [0, 0], sizes = [1, 32], strides = [1, 1]} : vector<64x32xf32> to vector<1x32xf32>
    %7 = tpu.concatenate %5, %6 in 0 : vector<63x32xf32>, vector<1x32xf32> -> vector<64x32xf32>
    %8 = vector.extract_strided_slice %4 {offsets = [57, 0], sizes = [7, 32], strides = [1, 1]} : vector<64x32xf32> to vector<7x32xf32>
    %9 = vector.extract_strided_slice %4 {offsets = [0, 0], sizes = [57, 32], strides = [1, 1]} : vector<64x32xf32> to vector<57x32xf32>
    %10 = tpu.concatenate %8, %9 in 0 : vector<7x32xf32>, vector<57x32xf32> -> vector<64x32xf32>
    %11 = tpu.iota {dimensions = array<i32: 0>} : vector<64x1xi32>
    %c8_i32 = arith.constant 8 : i32
    %c0_i32 = arith.constant 0 : i32
    %12 = arith.cmpi eq, %c8_i32, %c0_i32 : i32
    %c1_i32 = arith.constant 1 : i32
    %13 = arith.select %12, %c1_i32, %c8_i32 : i32
    %14 = vector.broadcast %13 : i32 to vector<64x1xi32>
    %15 = arith.remsi %11, %14 : vector<64x1xi32>
    %c0_i32_6 = arith.constant 0 : i32
    %16 = vector.broadcast %c0_i32_6 : i32 to vector<64x1xi32>
    %17 = arith.cmpi ne, %15, %16 : vector<64x1xi32>
    %c0_i32_7 = arith.constant 0 : i32
    %18 = vector.broadcast %c0_i32_7 : i32 to vector<64x1xi32>
    %19 = arith.cmpi slt, %15, %18 : vector<64x1xi32>
    %c0_i32_8 = arith.constant 0 : i32
    %20 = arith.cmpi slt, %13, %c0_i32_8 : i32
    %21 = vector.broadcast %20 : i1 to vector<64x1xi1>
    %22 = vector.broadcast %21 : vector<64x1xi1> to vector<64x1xi1>
    %23 = arith.xori %19, %22 : vector<64x1xi1>
    %24 = arith.andi %23, %17 : vector<64x1xi1>
    %25 = vector.broadcast %13 : i32 to vector<64x1xi32>
    %26 = arith.addi %15, %25 : vector<64x1xi32>
    %27 = arith.select %24, %26, %15 : vector<64x1xi1>, vector<64x1xi32>
    %c7_i32 = arith.constant 7 : i32
    %28 = vector.broadcast %c7_i32 : i32 to vector<64x1xi32>
    %29 = arith.cmpi eq, %27, %28 : vector<64x1xi32>
    %30 = vector.shape_cast %29 : vector<64x1xi1> to vector<64x1xi1>
    %31 = vector.broadcast %30 : vector<64x1xi1> to vector<64x32xi1>
    %32 = arith.select %31, %10, %7 : vector<64x32xi1>, vector<64x32xf32>
    %33 = arith.addf %2, %32 : vector<64x32xf32>
    %c0_9 = arith.constant 0 : index
    %c0_10 = arith.constant 0 : index
    %34 = vector.load %arg4[%c0_9, %c0_10] : memref<64x32xf32, #tpu.memory_space<vmem>>, vector<64x32xf32>
    tpu.vector_store %arg4[%c0_9, %c0_10], %33 {strides = array<i32>} : memref<64x32xf32, #tpu.memory_space<vmem>>, vector<64x32xf32>,
    return
  }
  func.func @transform_0(%arg0: i32) -> (i32, i32) {
    %c0_i32 = arith.constant 0 : i32
    %c0_i32_0 = arith.constant 0 : i32
    return %arg0, %c0_i32 : i32, i32
  }
  func.func @transform_1(%arg0: i32) -> (i32, i32) {
    %c0_i32 = arith.constant 0 : i32
    %c0_i32_0 = arith.constant 0 : i32
    %c0_i32_1 = arith.constant 0 : i32
    return %c0_i32, %c0_i32_0 : i32, i32
  }
  func.func @transform_2(%arg0: i32) -> (i32, i32) {
    %c0_i32 = arith.constant 0 : i32
    %c0_i32_0 = arith.constant 0 : i32
    %c0_i32_1 = arith.constant 0 : i32
    return %c0_i32, %c0_i32_0 : i32, i32
  }
  func.func @transform_3(%arg0: i32) -> (i32, i32) {
    %c0_i32 = arith.constant 0 : i32
    %c0_i32_0 = arith.constant 0 : i32
    return %arg0, %c0_i32 : i32, i32
  }
}

</mosaic_0001>

<bundles_post_ra>
// kernel: tpu_custom_call.1
= control target key start
LH: loop header
LB: loop body
LE: loop exit
PB: predicated region body
PF: predicated region fallthrough
CT: control target
= control target key end

     0   :  { %vm30_vm0 = vcmask 261120   ;;  %v194_v20 = vlaneseq  ;;  %vm168_vm1 = vcmask 1046528   ;;  %s710_s2 = inlined_call_operand.vmem [shape: f32[32,32], index: 2, kind: input, shape index: {}]   ;;  %s711_s1 = inlined_call_operand.vmem [shape: f32[32,32], index: 1, kind: input, shape index: {}]   ;;  %s712_s0 = inlined_call_operand.vmem [shape: f32[64,32], index: 0, kind: input, shape index: {}]   ;;  %s713_s3 = inlined_call_operand.vmem [shape: f32[64,32], index: 3, kind: output, shape index: {}]  }
   0x1   :  { %v26_v0 = vld [vmem:[%s710_s2] sm:$0xff]  ;;  %v27_v1 = vld [vmem:[%s710_s2 + $0x8] sm:$0xff]  ;;  %v28_v5 = vld [vmem:[%s710_s2 + $0x10] sm:$0xff] }
   0x2   :  { %v22_v2 = vld [vmem:[%s711_s1] sm:$0xff]  ;;  %v528_v3 = vpack.c.bf16 %v27_v1, %v26_v0  ;;  %v23_v4 = vld [vmem:[%s711_s1 + $0x8] sm:$0xff]  ;;  %v29_v6 = vld [vmem:[%s710_s2 + $0x18] sm:$0xff]  ;;  %v195_v21 = vshrl.u32 %v194_v20, 7 }
   0x3   :  { %v536_v7 = vpack.c.bf16 %v23_v4, %v22_v2  ;;  %v532_v8 = vpack.c.bf16 %v29_v6, %v28_v5  ;;  %v14_v9 = vld [vmem:[%s712_s0] sm:$0xff]  ;;  %v24_v10 = vld [vmem:[%s711_s1 + $0x10] sm:$0xff]  ;;  %v25_v11 = vld [vmem:[%s711_s1 + $0x18] sm:$0xff] }
   0x4   :  { %529 = vmatprep.subr.bf16.mxu0 %v528_v3  ;;  %496 = vmatprep.mubr.msk.f32.mxu0 %vm30_vm0, %v14_v9  ;;  %v540_v12 = vpack.c.bf16 %v25_v11, %v24_v10  ;;  %v15_v13 = vld [vmem:[%s712_s0 + $0x8] sm:$0xff]  ;;  %v16_v14 = vld [vmem:[%s712_s0 + $0x10] sm:$0xff]  ;;  %v17_v15 = vld [vmem:[%s712_s0 + $0x18] sm:$0xff]  ;;  %v196_v22 = vadd.s32 8, %v195_v21  ;;  %v197_v23 = vadd.s32 16, %v195_v21  ;;  %v198_v24 = vadd.s32 24, %v195_v21 }
   0x5   :  { %531 = vmatpush3.bf16.msra.mxu0 %v528_v3  ;;  %537 = vmatprep.subr.bf16.mxu1 %v536_v7  ;;  %v18_v16 = vld [vmem:[%s712_s0 + $0x20] sm:$0xff]  ;;  %v19_v17 = vld [vmem:[%s712_s0 + $0x28] sm:$0xff]  ;;  %v20_v18 = vld [vmem:[%s712_s0 + $0x30] sm:$0xff]  ;;  %v199_v25 = vadd.s32 32, %v195_v21  ;;  %v202_v38 = vadd.s32 56, %v195_v21  ;;  %v200_v42 = vadd.s32 40, %v195_v21 }
   0x6   :  { %533 = vmatprep.subr.bf16.mxu0 %v532_v8  ;;  %539 = vmatpush3.bf16.msra.mxu1 %v536_v7  ;;  %v21_v19 = vld [vmem:[%s712_s0 + $0x38] sm:$0xff]  ;;  %v214_v32 = vand.u32 7, %v196_v22  ;;  %v221_v33 = vand.u32 7, %v197_v23  ;;  %v228_v34 = vand.u32 7, %v198_v24  ;;  %v201_v47 = vadd.s32 48, %v195_v21 }
   0x7   :  { %541 = vmatprep.subr.bf16.mxu1 %v540_v12  ;;  %516 = vmatprep.mubr.msk.f32.mxu1 %vm30_vm0, %v14_v9  ;;  %v235_v35 = vand.u32 7, %v199_v25  ;;  %v207_v53 = vand.u32 7, %v195_v21  ;;  %v256_v54 = vand.u32 7, %v202_v38  ;;  %v242_v60 = vand.u32 7, %v200_v42 }
   0x8   :  { %vm629_vm2 = vcmp.eq.s32.totalorder %v214_v32, 7  ;;  %vm633_vm3 = vcmp.eq.s32.totalorder %v221_v33, 7  ;;  %vm637_vm4 = vcmp.eq.s32.totalorder %v228_v34, 7  ;;  %v249_v1 = vand.u32 7, %v201_v47 }
   0x9   :  { %535 = vmatpush3.bf16.msra.mxu0 %v532_v8  ;;  %vm641_vm5 = vcmp.eq.s32.totalorder %v235_v35, 7  ;;  %vm661_vm6 = vcmp.eq.s32.totalorder %v207_v53, 7  ;;  %vm665_vm7 = vcmp.eq.s32.totalorder %v256_v54, 7  ;;  %vm673_vm8 = vcmp.eq.s32.totalorder %v242_v60, 7 }
   0xa   :  { %543 = vmatpush3.bf16.msra.mxu1 %v540_v12  ;;  %vm305_vm9 = vcmp.eq.s32.totalorder %v249_v1, 7 }
   0xc   :  { %497 = vmatmul.mubr.msk.f32.vlgmr.msra.gmra.mrb[0].mxu0 %vm30_vm0, %v15_v13 }
   0xd   :  { %499 = vmatprep.mubr.msk.f32.mxu0 %vm30_vm0, %v16_v14  ;;  %517 = vmatmul.mubr.msk.f32.vlgmr.msra.gmra.mrb[0].mxu1 %vm30_vm0, %v15_v13 }
   0xe   :  { %519 = vmatprep.mubr.msk.f32.mxu1 %vm30_vm0, %v16_v14 }
  0x10   :  { %500 = vmatmul.mubr.msk.f32.gmra.mrb[2].mxu0 %vm30_vm0, %v17_v15 }
  0x11   :  { %502 = vmatprep.mubr.msk.f32.mxu0 %vm30_vm0, %v18_v16  ;;  %520 = vmatmul.mubr.msk.f32.gmra.mrb[2].mxu1 %vm30_vm0, %v17_v15 }
  0x12   :  { %522 = vmatprep.mubr.msk.f32.mxu1 %vm30_vm0, %v18_v16 }
  0x14   :  { %503 = vmatmul.mubr.msk.f32.gmra.mrb[4].mxu0 %vm30_vm0, %v19_v17 }
  0x15   :  { %505 = vmatprep.mubr.msk.f32.mxu0 %vm30_vm0, %v20_v18  ;;  %523 = vmatmul.mubr.msk.f32.gmra.mrb[4].mxu1 %vm30_vm0, %v19_v17 }
  0x16   :  { %525 = vmatprep.mubr.msk.f32.mxu1 %vm30_vm0, %v20_v18 }
  0x18   :  { %506 = vmatmul.mubr.msk.f32.gmra.mrb[6].mxu0 %vm30_vm0, %v21_v19 }
  0x19   :  { %526 = vmatmul.mubr.msk.f32.gmra.mrb[6].mxu1 %vm30_vm0, %v21_v19 }
  0xdf   :  { %v498_v26 = vpop.f32.mrb[0].mxu0 }
  0xe0   :  { %v170_v27 = vrot.slane %v498_v26, 1  ;;  %v121_v28 = vpop.f32.mrb[1].mxu0  ;;  %v518_v29 = vpop.f32.mrb[0].mxu1 }
  0xe1   :  { %v169_v30 = vrot.slane %v121_v28, 1  ;;  %v397_v31 = vpop.f32.mrb[1].mxu1 }
  0xe3   :  { %v171_v36 = vsel %vm168_vm1, %v169_v30, %v170_v27  ;;  %v501_v37 = vpop.f32.mrb[2].mxu0 }
  0xe4   :  { %v174_v39 = vrot.slane %v501_v37, 1  ;;  %v131_v40 = vpop.f32.mrb[3].mxu0  ;;  %v521_v41 = vpop.f32.mrb[2].mxu1 }
  0xe5   :  { %v172_v43 = vrot.slane %v131_v40, 1  ;;  %v407_v46 = vpop.f32.mrb[3].mxu1 }
  0xe7   :  { %v504_v50 = vpop.f32.mrb[4].mxu0  ;;  %v173_v51 = vsel %vm168_vm1, %v170_v27, %v172_v43  ;;  %v175_v52 = vsel %vm168_vm1, %v172_v43, %v174_v39 }
  0xe8   :  { %v178_v55 = vrot.slane %v504_v50, 1  ;;  %v324_v56 = vsel %vm629_vm2, %v171_v36, %v173_v51  ;;  %v325_v57 = vsel %vm633_vm3, %v173_v51, %v175_v52  ;;  %v141_v58 = vpop.f32.mrb[5].mxu0  ;;  %v524_v59 = vpop.f32.mrb[4].mxu1 }
  0xe9   :  { %v403_v61 = vadd.f32 %v518_v29, %v324_v56  ;;  %v408_v62 = vadd.f32 %v407_v46, %v325_v57  ;;  %v176_v63 = vrot.slane %v141_v58, 1  ;;  %v417_v0 = vpop.f32.mrb[5].mxu1 }
  0xeb   :  { %437 = vst.msk [vmem:[%s713_s3 + $0x8] sm:$0xff] %vm30_vm0, %v403_v61  ;;  %438 = vst.msk [vmem:[%s713_s3 + $0x10] sm:$0xff] %vm30_vm0, %v408_v62  ;;  %v507_v2 = vpop.f32.mrb[6].mxu0  ;;  %v177_v3 = vsel %vm168_vm1, %v174_v39, %v176_v63  ;;  %v179_v4 = vsel %vm168_vm1, %v176_v63, %v178_v55 }
  0xec   :  { %v182_v7 = vrot.slane %v507_v2, 1  ;;  %v326_v8 = vsel %vm637_vm4, %v175_v52, %v177_v3  ;;  %v327_v9 = vsel %vm641_vm5, %v177_v3, %v179_v4  ;;  %v151_v10 = vpop.f32.mrb[7].mxu0  ;;  %v527_v11 = vpop.f32.mrb[6].mxu1 }
  0xed   :  { %v413_v13 = vadd.f32 %v521_v41, %v326_v8  ;;  %v418_v14 = vadd.f32 %v417_v0, %v327_v9  ;;  %v180_v15 = vrot.slane %v151_v10, 1  ;;  %v427_v16 = vpop.f32.mrb[7].mxu1 }
  0xee   :  { %v193_v17 = vsel %vm168_vm1, %v182_v7, %v169_v30 }
  0xef   :  { %439 = vst.msk [vmem:[%s713_s3 + $0x18] sm:$0xff] %vm30_vm0, %v413_v13  ;;  %440 = vst.msk [vmem:[%s713_s3 + $0x20] sm:$0xff] %vm30_vm0, %v418_v14  ;;  %v183_v18 = vsel %vm168_vm1, %v180_v15, %v182_v7  ;;  %v323_v19 = vsel %vm661_vm6, %v193_v17, %v171_v36  ;;  %v181_v20 = vsel %vm168_vm1, %v178_v55, %v180_v15 }
  0xf0   :  { %v330_v21 = vsel %vm665_vm7, %v183_v18, %v193_v17  ;;  %v398_v22 = vadd.f32 %v397_v31, %v323_v19  ;;  %v328_v23 = vsel %vm673_vm8, %v179_v4, %v181_v20  ;;  %v329_v24 = vsel %vm305_vm9, %v181_v20, %v183_v18 }
  0xf1   :  { %v433_v25 = vadd.f32 %v527_v11, %v330_v21  ;;  %v423_v26 = vadd.f32 %v524_v59, %v328_v23  ;;  %v428_v27 = vadd.f32 %v427_v16, %v329_v24 }
  0xf2   :  { %436 = vst.msk [vmem:[%s713_s3] sm:$0xff] %vm30_vm0, %v398_v22 }
  0xf3   :  { %443 = vst.msk [vmem:[%s713_s3 + $0x38] sm:$0xff] %vm30_vm0, %v433_v25  ;;  %441 = vst.msk [vmem:[%s713_s3 + $0x28] sm:$0xff] %vm30_vm0, %v423_v26 }
  0xf4   :  { %442 = vst.msk [vmem:[%s713_s3 + $0x30] sm:$0xff] %vm30_vm0, %v428_v27 }

</bundles_post_ra>
